<compile_context>
chip_gen: v7x
topology: tpu7x:2x2x1
jax: 0.10.0
libtpu: 0.0.40
codegen_flags: <defaults>
</compile_context>

<pallas_src>
import jax
import jax.numpy as jnp
from jax.experimental import pallas as pl
from jax.experimental.pallas import tpu as pltpu


def _round_up(x, m):
    return ((x + m - 1) // m) * m


def _cdiv(a, b):
    return (a + b - 1) // b


def _vmem_capacity_bytes():
    """Physical VMEM per TensorCore; conservative 64 MiB (v7x) fallback."""
    try:
        info = pltpu.get_tpu_info()
        for attr in ("vmem_capacity_bytes", "vmem_size_bytes", "vmem_bytes"):
            v = getattr(info, attr, None)
            if v:
                return int(v)
    except Exception:
        pass
    return 64 * 1024 * 1024


def _patch_embed_kernel(p_ref, w_ref, b_ref, o_ref):
    # p_ref: [tm, K] (f32 or bf16), w_ref: [K, Eout] (f32 or bf16),
    # b_ref: [1, Eout] f32, o_ref: [tm, Eout]
    acc = jnp.dot(p_ref[...], w_ref[...], preferred_element_type=jnp.float32)
    o_ref[...] = (acc + b_ref[...]).astype(o_ref.dtype)


def patch_embedding(x, conv_weight, conv_bias, patch_size, *,
                    tile_m=4096, compute_dtype=jnp.bfloat16, out_dtype=None):
    """
    x            : [B, C, H, W]   (NCHW, matching the PyTorch module)
    conv_weight  : [E, C, P, P]   (PyTorch Conv2d weight layout)
    conv_bias    : [E]
    compute_dtype: dtype the patches/weight are streamed in (None = keep x's
                   dtype).  Accumulation is always f32.
    out_dtype    : output dtype (None = x.dtype).
    returns (tokens [B, num_patches, E], (H//P, W//P))
    """
    B, C, H, W = x.shape
    E = conv_weight.shape[0]
    P = patch_size
    assert H % P == 0 and W % P == 0, "H and W must be divisible by patch_size"
    Hp, Wp = H // P, W // P
    num_patches = Hp * Wp
    M = B * num_patches
    K = C * P * P
    out_dtype = x.dtype if out_dtype is None else out_dtype

    # --- patch extraction (layout glue).  allow_input_fusion below lets XLA
    # fold this copy (and the bf16 cast) into the pallas_call input fetch. ----
    # TODO(synk): for NHWC inputs this becomes a pure reshape; accept that
    # layout upstream to guarantee a zero-copy path on every XLA version.
    patches = x.reshape(B, C, Hp, P, Wp, P)
    patches = patches.transpose(0, 2, 4, 1, 3, 5).reshape(M, K)
    w = conv_weight.reshape(E, K).T                      # [K, E]
    b = conv_bias.reshape(1, E).astype(jnp.float32)      # bias stays f32

    if compute_dtype is not None:
        patches = patches.astype(compute_dtype)
        w = w.astype(compute_dtype)

    in_itemsize = jnp.dtype(patches.dtype).itemsize
    w_itemsize = jnp.dtype(w.dtype).itemsize
    out_itemsize = jnp.dtype(out_dtype).itemsize

    # --- embed dim: pad to a lane multiple only when it is nearly free -------
    Eout = E
    if E % 128 != 0:
        e_pad = _round_up(E, 128)
        if (e_pad - E) * 10 <= E:          # <= 10% extra output bytes
            Eout = e_pad
    if Eout != E:
        w = jnp.pad(w, ((0, 0), (0, Eout - E)))
        b = jnp.pad(b, ((0, 0), (0, Eout - E)))

    # --- M tile: biggest that fits the per-generation VMEM budget ------------
    min_tm = 8 * max(1, 4 // in_itemsize)   # 8 (f32) / 16 (bf16) / 32 (int8)
    vmem = _vmem_capacity_bytes()
    budget = vmem // 2                      # 64 MiB on v5e/v6e, 32 MiB on v7x
    vmem_limit = (vmem * 3) // 4            # 96 MiB          , 48 MiB

    def vmem_use(tm_rows):
        # double-buffered patch + output streams, resident weight/bias
        return (2 * tm_rows * (K * in_itemsize + Eout * out_itemsize)
                + K * Eout * w_itemsize + Eout * 4)

    tm = _round_up(max(min(tile_m, M), 1), min_tm)
    while tm > min_tm and vmem_use(tm) > budget:
        tm = _round_up(max(tm // 2, min_tm), min_tm)

    # Prefer >=4 grid steps and an even step count so dimension_semantics=
    # ("parallel",) can shard M across both v7x TensorCores with >=2 pipelined
    # steps per core.  Heuristic only; never affects results.
    steps = _cdiv(M, tm)
    if steps < 4 and M >= 4 * min_tm:
        tm = _round_up(_cdiv(M, 4), min_tm)
        steps = _cdiv(M, tm)
    if steps > 2 and steps % 2 == 1 and M >= (steps + 1) * min_tm:
        tm_even = _round_up(_cdiv(M, steps + 1), min_tm)
        if tm_even >= min_tm and _cdiv(M, tm_even) % 2 == 0:
            tm = tm_even
            steps = _cdiv(M, tm)
    grid = (steps,)

    cost = pl.CostEstimate(
        flops=2 * M * K * Eout,
        transcendentals=0,
        bytes_accessed=(M * K * in_itemsize + K * Eout * w_itemsize
                        + Eout * 4 + M * Eout * out_itemsize),
    )

    def build(resident_single_buffer, input_fusion):
        resident_kw = (dict(pipeline_mode=pl.Buffered(1))
                       if resident_single_buffer else {})
        grid_spec = pltpu.PrefetchScalarGridSpec(
            num_scalar_prefetch=0,
            grid=grid,
            in_specs=[
                pl.BlockSpec((tm, K), lambda i: (i, 0)),            # streams M
                pl.BlockSpec((K, Eout), lambda i: (0, 0), **resident_kw),
                pl.BlockSpec((1, Eout), lambda i: (0, 0), **resident_kw),
            ],
            out_specs=pl.BlockSpec((tm, Eout), lambda i: (i, 0)),
        )
        return pl.pallas_call(
            _patch_embed_kernel,
            out_shape=jax.ShapeDtypeStruct((M, Eout), out_dtype),
            grid_spec=grid_spec,
            compiler_params=pltpu.CompilerParams(
                dimension_semantics=("parallel",),
                vmem_limit_bytes=vmem_limit,
                allow_input_fusion=([True, False, False]
                                    if input_fusion else None),
            ),
            cost_estimate=cost,
        )

    try:
        out = build(True, True)(patches, w, b)
    except Exception:
        # Some jax revisions reject pl.Buffered(1) / allow_input_fusion on a
        # plain pallas_call; fall back to the default (still double-buffered,
        # pipelined) configuration — identical results, slightly more VMEM.
        out = build(False, False)(patches, w, b)

    if Eout != E:
        out = out[:, :E]
    tokens = out.reshape(B, num_patches, E)
    return tokens, (Hp, Wp)


if __name__ == "__main__":
    # Small shapes consistent with the module's forward.
    B, C, H, W = 2, 4, 16, 16
    P = 4          # patch_size
    E = 32         # embed_dim

    key = jax.random.PRNGKey(0)
    kx, kw, kb = jax.random.split(key, 3)

    x = jax.random.normal(kx, (B, C, H, W), dtype=jnp.float32)
    conv_weight = jax.random.normal(kw, (E, C, P, P), dtype=jnp.float32) * 0.02
    conv_bias = jax.random.normal(kb, (E,), dtype=jnp.float32) * 0.01

    # Pure-JAX reference (the conv the PyTorch module performs).
    Hp, Wp = H // P, W // P
    ref = jax.lax.conv_general_dilated(
        x, conv_weight, window_strides=(P, P), padding="VALID",
        dimension_numbers=("NCHW", "OIHW", "NCHW"),
    ) + conv_bias.reshape(1, E, 1, 1)
    ref = ref.reshape(B, E, Hp * Wp).transpose(0, 2, 1)

    # 1) Default path: bf16 streaming, auto tile size.
    tok_bf16, (hp, wp) = patch_embedding(x, conv_weight, conv_bias, P)
    tok_bf16 = jax.block_until_ready(tok_bf16)
    assert tok_bf16.shape == (B, Hp * Wp, E) and (hp, wp) == (Hp, Wp)
    assert jnp.allclose(tok_bf16, ref, atol=2e-2, rtol=2e-2)

    # 2) f32 streaming, tight tolerance.
    tok_f32, _ = patch_embedding(x, conv_weight, conv_bias, P,
                                 compute_dtype=None)
    tok_f32 = jax.block_until_ready(tok_f32)
    assert jnp.allclose(tok_f32, ref, atol=1e-4, rtol=1e-4)

    # 3) Small tile to exercise the multi-step, pipelined grid path.
    tok_small, _ = patch_embedding(x, conv_weight, conv_bias, P, tile_m=16)
    tok_small = jax.block_until_ready(tok_small)
    assert jnp.allclose(tok_small, ref, atol=2e-2, rtol=2e-2)

    print("KERNEL_OK")
</pallas_src>

<mosaic_0001>
module attributes {stable_mosaic.version = 11 : i64} {
  func.func @_patch_embed_kernel(%arg0: i32, %arg1: memref<32x64xbf16, #tpu.memory_space<vmem>>, %arg2: memref<64x32xbf16, #tpu.memory_space<vmem>>, %arg3: memref<1x32xf32, #tpu.memory_space<vmem>>, %arg4: memref<32x32xf32, #tpu.memory_space<vmem>>) attributes {dimension_semantics = [#tpu.dimension_semantics<parallel>], iteration_bounds = array<i64: 1>, scalar_prefetch = 0 : i64, scratch_operands = 0 : i64, tpu.core_type = #tpu.core_type<tc>, window_params = [{transform_indices = @transform_0, window_bounds = array<i64: 32, 64>}, {pipeline_mode = #tpu.pipeline_mode<synchronous>, transform_indices = @transform_1, window_bounds = array<i64: 64, 32>}, {pipeline_mode = #tpu.pipeline_mode<synchronous>, transform_indices = @transform_2, window_bounds = array<i64: 1, 32>}, {transform_indices = @transform_3, window_bounds = array<i64: 32, 32>}]} {
    %c0 = arith.constant 0 : index
    %c0_0 = arith.constant 0 : index
    %0 = vector.load %arg1[%c0, %c0_0] : memref<32x64xbf16, #tpu.memory_space<vmem>>, vector<32x64xbf16>
    %c0_1 = arith.constant 0 : index
    %c0_2 = arith.constant 0 : index
    %1 = vector.load %arg2[%c0_1, %c0_2] : memref<64x32xbf16, #tpu.memory_space<vmem>>, vector<64x32xbf16>
    %cst = arith.constant dense<0.000000e+00> : vector<32x32xf32>
    %2 = tpu.matmul %0, %1, %cst {dimension_numbers = #tpu.dot_dimension_numbers<[1], [0], [0], [1], [0, 0, 1, 1], [], []>} : vector<32x64xbf16>, vector<64x32xbf16>, vector<32x32xf32> -> vector<32x32xf32>
    %c0_3 = arith.constant 0 : index
    %c0_4 = arith.constant 0 : index
    %3 = vector.load %arg3[%c0_3, %c0_4] : memref<1x32xf32, #tpu.memory_space<vmem>>, vector<1x32xf32>
    %4 = vector.broadcast %3 : vector<1x32xf32> to vector<32x32xf32>
    %5 = arith.addf %2, %4 : vector<32x32xf32>
    %c0_5 = arith.constant 0 : index
    %c0_6 = arith.constant 0 : index
    %6 = vector.load %arg4[%c0_5, %c0_6] : memref<32x32xf32, #tpu.memory_space<vmem>>, vector<32x32xf32>
    tpu.vector_store %arg4[%c0_5, %c0_6], %5 {strides = array<i32>} : memref<32x32xf32, #tpu.memory_space<vmem>>, vector<32x32xf32>,
    return
  }
  func.func @transform_0(%arg0: i32) -> (i32, i32) {
    %c0_i32 = arith.constant 0 : i32
    %c0_i32_0 = arith.constant 0 : i32
    return %arg0, %c0_i32 : i32, i32
  }
  func.func @transform_1(%arg0: i32) -> (i32, i32) {
    %c0_i32 = arith.constant 0 : i32
    %c0_i32_0 = arith.constant 0 : i32
    %c0_i32_1 = arith.constant 0 : i32
    return %c0_i32, %c0_i32_0 : i32, i32
  }
  func.func @transform_2(%arg0: i32) -> (i32, i32) {
    %c0_i32 = arith.constant 0 : i32
    %c0_i32_0 = arith.constant 0 : i32
    %c0_i32_1 = arith.constant 0 : i32
    return %c0_i32, %c0_i32_0 : i32, i32
  }
  func.func @transform_3(%arg0: i32) -> (i32, i32) {
    %c0_i32 = arith.constant 0 : i32
    %c0_i32_0 = arith.constant 0 : i32
    return %arg0, %c0_i32 : i32, i32
  }
}

module attributes {stable_mosaic.version = 11 : i64} {
  func.func @_patch_embed_kernel(%arg0: i32, %arg1: memref<32x64xbf16, #tpu.memory_space<vmem>>, %arg2: memref<64x32xbf16, #tpu.memory_space<vmem>>, %arg3: memref<1x32xf32, #tpu.memory_space<vmem>>, %arg4: memref<32x32xf32, #tpu.memory_space<vmem>>) attributes {dimension_semantics = [#tpu.dimension_semantics<parallel>], iteration_bounds = array<i64: 1>, scalar_prefetch = 0 : i64, scratch_operands = 0 : i64, tpu.core_type = #tpu.core_type<tc>, window_params = [{transform_indices = @transform_0, window_bounds = array<i64: 32, 64>}, {pipeline_mode = #tpu.pipeline_mode<synchronous>, transform_indices = @transform_1, window_bounds = array<i64: 64, 32>}, {pipeline_mode = #tpu.pipeline_mode<synchronous>, transform_indices = @transform_2, window_bounds = array<i64: 1, 32>}, {transform_indices = @transform_3, window_bounds = array<i64: 32, 32>}]} {
    %c0 = arith.constant 0 : index
    %c0_0 = arith.constant 0 : index
    %0 = vector.load %arg1[%c0, %c0_0] : memref<32x64xbf16, #tpu.memory_space<vmem>>, vector<32x64xbf16>
    %c0_1 = arith.constant 0 : index
    %c0_2 = arith.constant 0 : index
    %1 = vector.load %arg2[%c0_1, %c0_2] : memref<64x32xbf16, #tpu.memory_space<vmem>>, vector<64x32xbf16>
    %cst = arith.constant dense<0.000000e+00> : vector<32x32xf32>
    %2 = tpu.matmul %0, %1, %cst {dimension_numbers = #tpu.dot_dimension_numbers<[1], [0], [0], [1], [0, 0, 1, 1], [], []>} : vector<32x64xbf16>, vector<64x32xbf16>, vector<32x32xf32> -> vector<32x32xf32>
    %c0_3 = arith.constant 0 : index
    %c0_4 = arith.constant 0 : index
    %3 = vector.load %arg3[%c0_3, %c0_4] : memref<1x32xf32, #tpu.memory_space<vmem>>, vector<1x32xf32>
    %4 = vector.broadcast %3 : vector<1x32xf32> to vector<32x32xf32>
    %5 = arith.addf %2, %4 : vector<32x32xf32>
    %c0_5 = arith.constant 0 : index
    %c0_6 = arith.constant 0 : index
    %6 = vector.load %arg4[%c0_5, %c0_6] : memref<32x32xf32, #tpu.memory_space<vmem>>, vector<32x32xf32>
    tpu.vector_store %arg4[%c0_5, %c0_6], %5 {strides = array<i32>} : memref<32x32xf32, #tpu.memory_space<vmem>>, vector<32x32xf32>,
    return
  }
  func.func @transform_0(%arg0: i32) -> (i32, i32) {
    %c0_i32 = arith.constant 0 : i32
    %c0_i32_0 = arith.constant 0 : i32
    return %arg0, %c0_i32 : i32, i32
  }
  func.func @transform_1(%arg0: i32) -> (i32, i32) {
    %c0_i32 = arith.constant 0 : i32
    %c0_i32_0 = arith.constant 0 : i32
    %c0_i32_1 = arith.constant 0 : i32
    return %c0_i32, %c0_i32_0 : i32, i32
  }
  func.func @transform_2(%arg0: i32) -> (i32, i32) {
    %c0_i32 = arith.constant 0 : i32
    %c0_i32_0 = arith.constant 0 : i32
    %c0_i32_1 = arith.constant 0 : i32
    return %c0_i32, %c0_i32_0 : i32, i32
  }
  func.func @transform_3(%arg0: i32) -> (i32, i32) {
    %c0_i32 = arith.constant 0 : i32
    %c0_i32_0 = arith.constant 0 : i32
    return %arg0, %c0_i32 : i32, i32
  }
}

</mosaic_0001>

<bundles_post_ra>
// kernel: tpu_custom_call.1
= control target key start
LH: loop header
LB: loop body
LE: loop exit
PB: predicated region body
PF: predicated region fallthrough
CT: control target
= control target key end

     0   :  { %vm69_vm0 = vcmask 523264   ;;  %s262_s0 = inlined_call_operand.vmem [shape: bf16[32,64], index: 0, kind: input, shape index: {}]   ;;  %s263_s1 = inlined_call_operand.vmem [shape: bf16[64,32], index: 1, kind: input, shape index: {}]   ;;  %s264_s2 = inlined_call_operand.vmem [shape: f32[1,32], index: 2, kind: input, shape index: {}]   ;;  %s265_s3 = inlined_call_operand.hbm [shape: f32[32,32], index: 3, kind: output, shape index: {}]  }
   0x1   :  { %v176_v0 = vld [vmem:[%s263_s1] sm:$0xff]   ;;  %v177_v1 = vld [vmem:[%s263_s1 + $0x8] sm:$0xff]   ;;  %v178_v2 = vld [vmem:[%s263_s1 + $0x10] sm:$0xff]  }
   0x2   :  { %161 = vmatprep.subr.bf16.mxu0 %v176_v0  ;;  %v180_v3 = vld [vmem:[%s262_s0] sm:$0xff]  }
   0x3   :  { %162 = vmatpush3.bf16.msra.mxu0 %v176_v0  ;;  %169 = vmatprep.mubr.msk.bf16.mxu0 %vm69_vm0, %v180_v3 }
   0x4   :  { %163 = vmatprep.subr.bf16.mxu0 %v177_v1 }
   0x5   :  { %8 = vsyncpa [#allocation3], 0  ;;  %v179_v4 = vld [vmem:[%s263_s1 + $0x18] sm:$0xff]   ;;  %v181_v5 = vld [vmem:[%s262_s0 + $0x8] sm:$0xff]   ;;  %vm125_vm1 = vcmask 261120   ;;  %s206_s26 = smov [#allocation2]  }
   0x6   :  { %v146_v6 = vld [vmem:[%s264_s2] ss:$0 sm:$0xff]  ;;  %s135_s27 = sshll.u32 %s206_s26, 4  ;;  %s136_s27 = int_to_ptr.vmem [resolvable:$true] %s135_s27 }
   0x7   :  { %164 = vmatpush3.bf16.msra.mxu0 %v177_v1  ;;  %s182_s0 = scalar_lea.vmem %s136_s27, 512  ;;  %p187_p1 = scmp.lt.s32.totalorder %s136_s27, %s136_s27 }
   0x8   :  { %165 = vmatprep.subr.bf16.mxu0 %v178_v2  ;;  %p183_p0 = scmp.ne.s32.totalorder %s136_s27, %s182_s0  ;;  %p188_p2 = scmp.lt.s32.totalorder %s182_s0, %s182_s0 }
   0xa   :  { %p189_p3 = por %p188_p2, %p187_p1 }
   0xb   :  { %166 = vmatpush3.bf16.msra.mxu0 %v178_v2 }
   0xc   :  { %167 = vmatprep.subr.bf16.mxu0 %v179_v4  ;;  %p190_p4 = pnand %p189_p3, %p183_p0 }
   0xf   :  { %168 = vmatpush3.bf16.msra.mxu0 %v179_v4 }
  0x12   :  { %170 = vmatmul.mubr.msk.bf16.vlgmr.msra.gmra.mrb[0].mxu0 %vm69_vm0, %v181_v5 }
  0xe5   :  { %v171_v7 = vpop.f32.mrb[0].mxu0 }
  0xe6   :  { %v119_v8 = vadd.f32 %v171_v7, %v146_v6  ;;  %v110_v9 = vpop.f32.mrb[1].mxu0 }
  0xe7   :  { %v111_v10 = vadd.f32 %v146_v6, %v110_v9  ;;  %v172_v11 = vpop.f32.mrb[2].mxu0 }
  0xe8   :  { %128 = vst.msk [vmem:[#allocation2 + $0x10] sm:$0xff] %vm125_vm1, %v119_v8  ;;  %v122_v12 = vadd.f32 %v172_v11, %v146_v6  ;;  %v113_v13 = vpop.f32.mrb[3].mxu0 }
  0xe9   :  { %126 = vst.msk [vmem:[#allocation2] sm:$0xff] %vm125_vm1, %v111_v10  ;;  %v114_v14 = vadd.f32 %v146_v6, %v113_v13 }
  0xea   :  { %129 = vst.msk [vmem:[#allocation2 + $0x18] sm:$0xff] %vm125_vm1, %v122_v12 }
  0xeb   :  { %127 = vst.msk [vmem:[#allocation2 + $0x8] sm:$0xff] %vm125_vm1, %v114_v14 }
  0xec   :  { %193 = shalt.err (!%p190_p4)
}
  0xed   :  { %s194_s28 = scalar_lea.hbm %s265_s3, 512 }
  0xee   :  { %p195_p5 = scmp.ne.s32.totalorder %s265_s3, %s194_s28  ;;  %p198_p6 = scmp.lt.u32.totalorder %s194_s28, %s265_s3 }
  0xf0   :  { %p200_p7 = pnand %p198_p6, %p195_p5 }
  0xf2   :  { %203 = shalt.err (!%p200_p7)
}
  0xf3   :  { %s207_s6 = smov 128   ;;  %s208_s7 = smov 8  }
  0xf4   :  { %141 = dma.vmem_to_hbm [thread:$0]  %s136_s27, 512, %s265_s3, [#allocation3], %s207_s6, %s207_s6, %s208_s7  }
  0xf5   :  { %204 = dma.done.wait [#allocation3], 512  }
  0xf6   :  { %205 = vsyncadd [#allocation3], 4294966784 }
  0xf7   :  { %145 = vsyncpa [#allocation3], 1 }

// kernel: tpu_custom_call.1
= control target key start
LH: loop header
LB: loop body
LE: loop exit
PB: predicated region body
PF: predicated region fallthrough
CT: control target
= control target key end

     0   :  { %vm69_vm0 = vcmask 523264   ;;  %s262_s0 = inlined_call_operand.vmem [shape: bf16[32,64], index: 0, kind: input, shape index: {}]   ;;  %s263_s1 = inlined_call_operand.vmem [shape: bf16[64,32], index: 1, kind: input, shape index: {}]   ;;  %s264_s2 = inlined_call_operand.vmem [shape: f32[1,32], index: 2, kind: input, shape index: {}]   ;;  %s265_s3 = inlined_call_operand.hbm [shape: f32[32,32], index: 3, kind: output, shape index: {}]  }
   0x1   :  { %v176_v0 = vld [vmem:[%s263_s1] sm:$0xff]   ;;  %v177_v1 = vld [vmem:[%s263_s1 + $0x8] sm:$0xff]   ;;  %v178_v2 = vld [vmem:[%s263_s1 + $0x10] sm:$0xff]  }
   0x2   :  { %161 = vmatprep.subr.bf16.mxu0 %v176_v0  ;;  %v180_v3 = vld [vmem:[%s262_s0] sm:$0xff]  }
   0x3   :  { %162 = vmatpush3.bf16.msra.mxu0 %v176_v0  ;;  %169 = vmatprep.mubr.msk.bf16.mxu0 %vm69_vm0, %v180_v3 }
   0x4   :  { %163 = vmatprep.subr.bf16.mxu0 %v177_v1 }
   0x5   :  { %8 = vsyncpa [#allocation3], 0  ;;  %v179_v4 = vld [vmem:[%s263_s1 + $0x18] sm:$0xff]   ;;  %v181_v5 = vld [vmem:[%s262_s0 + $0x8] sm:$0xff]   ;;  %vm125_vm1 = vcmask 261120   ;;  %s206_s26 = smov [#allocation2]  }
   0x6   :  { %v146_v6 = vld [vmem:[%s264_s2] ss:$0 sm:$0xff]  ;;  %s135_s27 = sshll.u32 %s206_s26, 4  ;;  %s136_s27 = int_to_ptr.vmem [resolvable:$true] %s135_s27 }
   0x7   :  { %164 = vmatpush3.bf16.msra.mxu0 %v177_v1  ;;  %s182_s0 = scalar_lea.vmem %s136_s27, 512  ;;  %p187_p1 = scmp.lt.s32.totalorder %s136_s27, %s136_s27 }
   0x8   :  { %165 = vmatprep.subr.bf16.mxu0 %v178_v2  ;;  %p183_p0 = scmp.ne.s32.totalorder %s136_s27, %s182_s0  ;;  %p188_p2 = scmp.lt.s32.totalorder %s182_s0, %s182_s0 }
   0xa   :  { %p189_p3 = por %p188_p2, %p187_p1 }
   0xb   :  { %166 = vmatpush3.bf16.msra.mxu0 %v178_v2 }
   0xc   :  { %167 = vmatprep.subr.bf16.mxu0 %v179_v4  ;;  %p190_p4 = pnand %p189_p3, %p183_p0 }
   0xf   :  { %168 = vmatpush3.bf16.msra.mxu0 %v179_v4 }
  0x12   :  { %170 = vmatmul.mubr.msk.bf16.vlgmr.msra.gmra.mrb[0].mxu0 %vm69_vm0, %v181_v5 }
  0xe5   :  { %v171_v7 = vpop.f32.mrb[0].mxu0 }
  0xe6   :  { %v119_v8 = vadd.f32 %v171_v7, %v146_v6  ;;  %v110_v9 = vpop.f32.mrb[1].mxu0 }
  0xe7   :  { %v111_v10 = vadd.f32 %v146_v6, %v110_v9  ;;  %v172_v11 = vpop.f32.mrb[2].mxu0 }
  0xe8   :  { %128 = vst.msk [vmem:[#allocation2 + $0x10] sm:$0xff] %vm125_vm1, %v119_v8  ;;  %v122_v12 = vadd.f32 %v172_v11, %v146_v6  ;;  %v113_v13 = vpop.f32.mrb[3].mxu0 }
  0xe9   :  { %126 = vst.msk [vmem:[#allocation2] sm:$0xff] %vm125_vm1, %v111_v10  ;;  %v114_v14 = vadd.f32 %v146_v6, %v113_v13 }
  0xea   :  { %129 = vst.msk [vmem:[#allocation2 + $0x18] sm:$0xff] %vm125_vm1, %v122_v12 }
  0xeb   :  { %127 = vst.msk [vmem:[#allocation2 + $0x8] sm:$0xff] %vm125_vm1, %v114_v14 }
  0xec   :  { %193 = shalt.err (!%p190_p4)
}
  0xed   :  { %s194_s28 = scalar_lea.hbm %s265_s3, 512 }
  0xee   :  { %p195_p5 = scmp.ne.s32.totalorder %s265_s3, %s194_s28  ;;  %p198_p6 = scmp.lt.u32.totalorder %s194_s28, %s265_s3 }
  0xf0   :  { %p200_p7 = pnand %p198_p6, %p195_p5 }
  0xf2   :  { %203 = shalt.err (!%p200_p7)
}
  0xf3   :  { %s207_s6 = smov 128   ;;  %s208_s7 = smov 8  }
  0xf4   :  { %141 = dma.vmem_to_hbm [thread:$0]  %s136_s27, 512, %s265_s3, [#allocation3], %s207_s6, %s207_s6, %s208_s7  }
  0xf5   :  { %204 = dma.done.wait [#allocation3], 512  }
  0xf6   :  { %205 = vsyncadd [#allocation3], 4294966784 }
  0xf7   :  { %145 = vsyncpa [#allocation3], 1 }

</bundles_post_ra>
